<compile_context>
chip_gen: v7x
topology: tpu7x:2x2x1
jax: 0.10.0
libtpu: 0.0.40
codegen_flags: <defaults>
</compile_context>

<pallas_src>
import jax
import jax.numpy as jnp
from jax.experimental import pallas as pl
from jax.experimental.pallas import tpu as pltpu


def _round_up(x: int, m: int) -> int:
    return ((x + m - 1) // m) * m


def _gain_rescale_kernel(g_ref, x_ref, o_ref):
    # g_ref: (TR, 1) per-row gain; x_ref/o_ref: (TR, TC) tile.
    # Single lane-broadcast VPU multiply on dense, vreg-shaped tiles.
    o_ref[...] = x_ref[...] * g_ref[...]


# Per-tile byte budget and explicit VMEM limit (see header notes).
_TARGET_TILE_BYTES = 4 << 20
_VMEM_LIMIT_BYTES = 32 << 20


def gain_module_forward(x, gain_matrix, n, l=1.0):
    """Pallas equivalent of Gain_Module.forward.

    x:           (B, C, H, W) float, NCHW
    gain_matrix: (n_scales, C) float
    n:           (B,) int indices into the scale axis
    l:           STATIC python float interpolation exponent
    """
    B, C, H, W = x.shape
    R = B * C
    S = H * W
    # `l` selects a branch at trace time; float() raises loudly if it is traced.
    l = float(l)

    # --- Tiny per-(batch, channel) gain table, computed once in the wrapper. ---
    # NOTE: gain_matrix[n[0] + 1] silently clamps if n[0] == n_scales - 1 (JAX
    # gather semantics); PyTorch would raise an index error instead.
    if l != 1.0:
        g1 = jnp.abs(gain_matrix[n])                    # (B, C)
        g2 = jnp.abs(gain_matrix[n[0] + 1])[None, :]    # (1, C)
        gain = g1 ** l * g2 ** (1.0 - l)                # (B, C)
    else:
        gain = jnp.abs(gain_matrix[n])                  # (B, C)
    gain_rows = gain.reshape(R, 1).astype(x.dtype)      # (B*C, 1)

    # --- Flatten to a 2-D (sublane, lane) view (metadata-only reshape). ---
    x2 = x.reshape(R, S)
    itemsize = jnp.dtype(x.dtype).itemsize

    # --- Tile selection: no wrapper padding; ragged edge blocks are masked. ---
    sub_mult = max(8, 32 // itemsize)      # 8 f32 / 16 bf16 / 32 int8-fp8
    lane_mult = 128
    R_full = _round_up(R, sub_mult)
    S_full = _round_up(S, lane_mult)

    # Row tile first (keeps the narrow gain block small), then widen the lane
    # tile up to the full flattened spatial extent to hit the byte budget.
    TR = min(R_full, 512)
    TC = min(
        S_full,
        max(lane_mult,
            (_TARGET_TILE_BYTES // (TR * itemsize)) // lane_mult * lane_mult),
    )
    if TC == S_full:
        # Lane axis exhausted below budget: grow the row tile instead.
        TR = min(
            R_full,
            max(sub_mult,
                (_TARGET_TILE_BYTES // (TC * itemsize)) // sub_mult * sub_mult),
        )

    n_row = pl.cdiv(R, TR)
    n_col = pl.cdiv(S, TC)

    cost = pl.CostEstimate(
        flops=R * S,
        transcendentals=0,
        bytes_accessed=2 * R * S * itemsize + R * itemsize,
    )
    cparams = pltpu.CompilerParams(
        dimension_semantics=("parallel",) if n_row == 1 else ("parallel", "parallel"),
        vmem_limit_bytes=_VMEM_LIMIT_BYTES,
    )

    if n_row == 1:
        # Single row block: 1-D column grid so the leading parallel axis has
        # multiple blocks (v7x megacore). Gain's block index is constant, so
        # its narrow DMA is issued once and stays resident.
        grid = (n_col,)
        in_specs = [
            pl.BlockSpec((TR, 1), lambda j: (0, 0)),
            pl.BlockSpec((TR, TC), lambda j: (0, j)),
        ]
        out_specs = pl.BlockSpec((TR, TC), lambda j: (0, j))
    else:
        # Rows outer, columns inner: gain's (TR, 1) block index is unchanged
        # across the inner sweep, so it is not re-fetched per column tile.
        grid = (n_row, n_col)
        in_specs = [
            pl.BlockSpec((TR, 1), lambda i, j: (i, 0)),
            pl.BlockSpec((TR, TC), lambda i, j: (i, j)),
        ]
        out_specs = pl.BlockSpec((TR, TC), lambda i, j: (i, j))

    out2 = pl.pallas_call(
        _gain_rescale_kernel,
        out_shape=jax.ShapeDtypeStruct((R, S), x.dtype),
        grid=grid,
        in_specs=in_specs,
        out_specs=out_specs,
        compiler_params=cparams,
        cost_estimate=cost,
    )(gain_rows, x2)

    return out2.reshape(B, C, H, W)


def _reference_forward(x, gain_matrix, n, l=1.0):
    """Plain-JAX reference matching the PyTorch module."""
    if l != 1.0:
        gain1 = gain_matrix[n]
        gain2 = gain_matrix[n[0] + 1][None, :]
        gain = jnp.abs(gain1) ** l * jnp.abs(gain2) ** (1.0 - l)
    else:
        gain = jnp.abs(gain_matrix[n])
    return gain[:, :, None, None] * x


if __name__ == "__main__":
    # Small shapes consistent with the module's forward: B=2, C=N=4, H=W=16,
    # n_scales=6 quantization levels.
    B, C, H, W = 2, 4, 16, 16
    n_scales = 6

    key = jax.random.PRNGKey(0)
    k_gain, k_x, k_x2 = jax.random.split(key, 3)

    # __init__ uses ones; use a deterministic non-trivial init (incl. negatives)
    # so the abs() / power path is actually exercised.
    gain_matrix = jax.random.uniform(
        k_gain, (n_scales, C), dtype=jnp.float32, minval=-1.5, maxval=1.5
    )
    x = jax.random.normal(k_x, (B, C, H, W), dtype=jnp.float32)
    n_idx = jnp.array([0, 2], dtype=jnp.int32)  # one quantization level per batch item

    # l == 1 path (default)
    out1 = gain_module_forward(x, gain_matrix, n_idx, l=1.0)
    jax.block_until_ready(out1)
    ref1 = _reference_forward(x, gain_matrix, n_idx, l=1.0)
    assert jnp.allclose(out1, ref1, rtol=1e-5, atol=1e-5)

    # l != 1 interpolation path
    out2 = gain_module_forward(x, gain_matrix, n_idx, l=0.7)
    jax.block_until_ready(out2)
    ref2 = _reference_forward(x, gain_matrix, n_idx, l=0.7)
    assert jnp.allclose(out2, ref2, rtol=1e-5, atol=1e-5)

    # Ragged shapes (rows not a multiple of 8, lanes not a multiple of 128):
    # exercises the pad-free cdiv grid with masked edge blocks.
    Br, Cr, Hr, Wr = 2, 3, 10, 13
    gm_r = jax.random.uniform(
        k_gain, (n_scales, Cr), dtype=jnp.float32, minval=-1.5, maxval=1.5
    )
    x_r = jax.random.normal(k_x2, (Br, Cr, Hr, Wr), dtype=jnp.float32)
    n_r = jnp.array([1, 4], dtype=jnp.int32)
    out3 = gain_module_forward(x_r, gm_r, n_r, l=1.0)
    jax.block_until_ready(out3)
    ref3 = _reference_forward(x_r, gm_r, n_r, l=1.0)
    assert jnp.allclose(out3, ref3, rtol=1e-5, atol=1e-5)

    print("KERNEL_OK")
</pallas_src>

<mosaic_0001>
module attributes {stable_mosaic.version = 11 : i64} {
  func.func @_gain_rescale_kernel(%arg0: i32, %arg1: memref<8x1xf32, #tpu.memory_space<vmem>>, %arg2: memref<8x256xf32, #tpu.memory_space<vmem>>, %arg3: memref<8x256xf32, #tpu.memory_space<vmem>>) attributes {dimension_semantics = [#tpu.dimension_semantics<parallel>], iteration_bounds = array<i64: 1>, scalar_prefetch = 0 : i64, scratch_operands = 0 : i64, tpu.core_type = #tpu.core_type<tc>, window_params = [{pipeline_mode = #tpu.pipeline_mode<synchronous>, transform_indices = @transform_0, window_bounds = array<i64: 8, 1>}, {transform_indices = @transform_1, window_bounds = array<i64: 8, 256>}, {transform_indices = @transform_2, window_bounds = array<i64: 8, 256>}]} {
    %c0 = arith.constant 0 : index
    %c0_0 = arith.constant 0 : index
    %0 = vector.load %arg2[%c0, %c0_0] : memref<8x256xf32, #tpu.memory_space<vmem>>, vector<8x256xf32>
    %c0_1 = arith.constant 0 : index
    %c0_2 = arith.constant 0 : index
    %1 = vector.load %arg1[%c0_1, %c0_2] : memref<8x1xf32, #tpu.memory_space<vmem>>, vector<8x1xf32>
    %2 = vector.broadcast %1 : vector<8x1xf32> to vector<8x256xf32>
    %3 = arith.mulf %0, %2 : vector<8x256xf32>
    %c0_3 = arith.constant 0 : index
    %c0_4 = arith.constant 0 : index
    %4 = vector.load %arg3[%c0_3, %c0_4] : memref<8x256xf32, #tpu.memory_space<vmem>>, vector<8x256xf32>
    tpu.vector_store %arg3[%c0_3, %c0_4], %3 {strides = array<i32>} : memref<8x256xf32, #tpu.memory_space<vmem>>, vector<8x256xf32>,
    return
  }
  func.func @transform_0(%arg0: i32) -> (i32, i32) {
    %c0_i32 = arith.constant 0 : i32
    %c0_i32_0 = arith.constant 0 : i32
    %c0_i32_1 = arith.constant 0 : i32
    return %c0_i32, %c0_i32_0 : i32, i32
  }
  func.func @transform_1(%arg0: i32) -> (i32, i32) {
    %c0_i32 = arith.constant 0 : i32
    %c0_i32_0 = arith.constant 0 : i32
    return %c0_i32, %arg0 : i32, i32
  }
  func.func @transform_2(%arg0: i32) -> (i32, i32) {
    %c0_i32 = arith.constant 0 : i32
    %c0_i32_0 = arith.constant 0 : i32
    return %c0_i32, %arg0 : i32, i32
  }
}

</mosaic_0001>

<bundles_post_ra>
// kernel: tpu_custom_call.1
= control target key start
LH: loop header
LB: loop body
LE: loop exit
PB: predicated region body
PF: predicated region fallthrough
CT: control target
= control target key end

     0   :  { %7 = vsyncpa [#allocation3], 0  ;;  %s148_s0 = inlined_call_operand.vmem [shape: f32[8,1], index: 0, kind: input, shape index: {}]   ;;  %s149_s1 = inlined_call_operand.hbm [shape: f32[8,256], index: 1, kind: input, shape index: {}]   ;;  %s150_s2 = inlined_call_operand.hbm [shape: f32[8,256], index: 2, kind: output, shape index: {}]  }
   0x1   :  { %8 = vsyncpa [#allocation4], 0  ;;  %s103_s9 = smov [#allocation2]   ;;  %s55_s13 = scalar_lea.hbm %s149_s1, 256 }
   0x2   :  { %s17_s10 = sshll.u32 %s103_s9, 4  ;;  %p56_p0 = scmp.ne.s32.totalorder %s149_s1, %s55_s13  ;;  %s18_s10 = int_to_ptr.vmem [resolvable:$true] %s17_s10 }
   0x3   :  { %p59_p1 = scmp.lt.u32.totalorder %s55_s13, %s149_s1 }
   0x5   :  { %p61_p2 = pnand %p59_p1, %p56_p0 }
   0x7   :  { %64 = shalt.err (!%p61_p2)
}
   0x8   :  { %s65_s18 = scalar_lea.vmem %s18_s10, 256  ;;  %p70_p4 = scmp.lt.s32.totalorder %s18_s10, %s18_s10 }
   0x9   :  { %p66_p3 = scmp.ne.s32.totalorder %s18_s10, %s65_s18  ;;  %p71_p5 = scmp.lt.s32.totalorder %s65_s18, %s65_s18 }
   0xb   :  { %p72_p6 = por %p71_p5, %p70_p4 }
   0xd   :  { %p73_p7 = pnand %p72_p6, %p66_p3 }
   0xf   :  { %76 = shalt.err (!%p73_p7)
}
  0x10   :  { %20 = dma.hbm_to_vmem [thread:$0]  %s149_s1, 256, %s18_s10, [#allocation3]  }
  0x11   :  { %99 = dma.done.wait [#allocation3], 256  }
  0x12   :  { %100 = vsyncadd [#allocation3], 4294967040  ;;  %v104_v0 = vmov 0   ;;  %v26_v1 = vld [vmem:[%s148_s0] sm:$0xff]  ;;  %v25_v3 = vld [vmem:[#allocation2 + $0x8] sm:$0xff]  ;;  %s105_s23 = smov [#allocation5]  }
  0x13   :  { %54 = vset.pattern.permute.xlu0 %v104_v0  ;;  %v24_v2 = vld [vmem:[#allocation2] sm:$0xff]  ;;  %s42_s24 = sshll.u32 %s105_s23, 4  ;;  %s43_s24 = int_to_ptr.vmem [resolvable:$true] %s42_s24 }
  0x14   :  { %29 = vperm.xlu0 %54, %v26_v1   ;;  %s77_s1 = scalar_lea.vmem %s43_s24, 256  ;;  %p82_p9 = scmp.lt.s32.totalorder %s43_s24, %s43_s24 }
  0x15   :  { %p78_p8 = scmp.ne.s32.totalorder %s43_s24, %s77_s1  ;;  %p83_p10 = scmp.lt.s32.totalorder %s77_s1, %s77_s1 }
  0x17   :  { %p84_p11 = por %p83_p10, %p82_p9 }
  0x19   :  { %p85_p12 = pnand %p84_p11, %p78_p8 }
  0x93   :  { %v30_v4 = vpop.permute.xlu0 %29 }
  0x94   :  { %v32_v5 = vmul.f32 %v30_v4, %v24_v2  ;;  %v33_v6 = vmul.f32 %v30_v4, %v25_v3 }
  0x96   :  { %34 = vst [vmem:[#allocation5] sm:$0xff] %v32_v5  ;;  %35 = vst [vmem:[#allocation5 + $0x8] sm:$0xff] %v33_v6 }
  0x97   :  { %88 = shalt.err (!%p85_p12)
}
  0x98   :  { %s89_s26 = scalar_lea.hbm %s150_s2, 256 }
  0x99   :  { %p90_p13 = scmp.ne.s32.totalorder %s150_s2, %s89_s26  ;;  %p93_p0 = scmp.lt.u32.totalorder %s89_s26, %s150_s2 }
  0x9b   :  { %p95_p1 = pnand %p93_p0, %p90_p13 }
  0x9d   :  { %98 = shalt.err (!%p95_p1)
}
  0x9e   :  { %45 = dma.vmem_to_hbm [thread:$0]  %s43_s24, 256, %s150_s2, [#allocation4]  }
  0x9f   :  { %101 = dma.done.wait [#allocation4], 256  }
  0xa0   :  { %102 = vsyncadd [#allocation4], 4294967040 }
  0xa1   :  { %49 = vsyncpa [#allocation3], 1 }
  0xa2   :  { %50 = vsyncpa [#allocation4], 1 }

</bundles_post_ra>
